<compile_context>
chip_gen: v7x
topology: tpu7x:2x2x1
jax: 0.10.0
libtpu: 0.0.40
codegen_flags: <defaults>
</compile_context>

<pallas_src>
import functools

import jax
import jax.numpy as jnp
from jax.experimental import pallas as pl
from jax.experimental.pallas import tpu as pltpu

K = 1024
D = 10


def _round_up(x, m):
    return ((x + m - 1) // m) * m


def _make_vq_kernel(n_valid):
    def vq_kernel(x_ref, et_ref, qt_ref, sse_ref):
        # x_ref:   (tn, D+1)  row tile of encoder embeddings, last column == 1.0
        # et_ref:  (D+1, K)   rows 0..D-1 = E^T, row D = -0.5 * ||E_k||^2
        # qt_ref:  (D+1, tn)  quantized output tile, transposed (lane-dense store);
        #                     row D is discarded by the wrapper.
        # sse_ref: (1, 1)     per-block sum of squared error (SMEM)
        tn = x_ref.shape[0]
        kk = et_ref.shape[1]

        x = x_ref[...]                      # (tn, D+1) f32
        et = et_ref[...]                    # (D+1, K)  f32

        # Single folded MXU matmul:
        #   score[n, k] = x[n].E[k] - 0.5*||E[k]||^2
        #   argmax_k score[n, :]  ==  argmin_k ||x[n] - E[k]||^2
        score = jnp.dot(x, et, preferred_element_type=jnp.float32)      # (tn, K)

        # First-max tie break (== torch.argmin's first-min on the distance).
        max_val = jnp.max(score, axis=1, keepdims=True)                 # (tn, 1)
        iota_row = jax.lax.broadcasted_iota(jnp.int32, (1, kk), 1)      # (1, K)
        idx = jnp.min(jnp.where(score >= max_val, iota_row, kk),
                      axis=1, keepdims=True)                            # (tn, 1)

        # Gather codebook rows as E_aug^T . onehot^T -> (D+1, tn): lane-dense.
        # (Relies on the f32 MXU multi-pass precision for q == E[idx] exactness.)
        onehot = (iota_row == idx).astype(jnp.float32)                  # (tn, K)
        q_aug_t = jax.lax.dot_general(
            et, onehot, (((1,), (1,)), ((), ())),
            preferred_element_type=jnp.float32)                         # (D+1, tn)
        qt_ref[...] = q_aug_t.astype(qt_ref.dtype)

        # Per-block SSE:  ||x - q||^2 == ||x||^2 - 2*(x.q - 0.5*||q||^2)
        #                            == ||x||^2 - 2*max_val,
        # with zero-padded rows masked out (they also have x2 == 0).
        x2 = jnp.sum(x * x, axis=1, keepdims=True) - 1.0                # drop ones col
        rows = (pl.program_id(0) * tn
                + jax.lax.broadcasted_iota(jnp.int32, (tn, 1), 0))      # (tn, 1)
        sse_ref[0, 0] = jnp.sum(
            jnp.where(rows < n_valid, x2 - 2.0 * max_val, 0.0))

    return vq_kernel


@functools.partial(jax.jit, static_argnames=("tn",))
def quantizer_forward(encoder_embedding, embedding_weight, *, tn=512):
    """Returns (quantized_embedding, quantization_loss) like Quantizer.forward."""
    x = encoder_embedding.astype(jnp.float32)
    emb = embedding_weight.astype(jnp.float32)
    n, d = x.shape
    k = emb.shape[0]

    # Tile choice: a single block if the (8-aligned) batch fits in one tile;
    # otherwise tiles must be multiples of 128 (lane-dense transposed output)
    # and are capped at half the batch so >=2 parallel blocks exist (v7x: 2 TCs).
    n8 = _round_up(n, 8)
    if n8 <= tn:
        tn_eff = n8
    else:
        half = _round_up((n8 + 1) // 2, 128)
        tn_eff = min(_round_up(tn, 128), half)
    n_pad = _round_up(n, tn_eff)
    num_blocks = n_pad // tn_eff

    # Hoisted prep (outside the grid loop): augmented operands fold the -2 scale
    # and the ||E_k||^2 bias into the distance matmul.
    x_aug = jnp.zeros((n_pad, d + 1), jnp.float32)
    x_aug = x_aug.at[:n, :d].set(x)
    x_aug = x_aug.at[:, d].set(1.0)

    e2 = jnp.sum(emb * emb, axis=1)                                  # (K,)
    et_aug = jnp.concatenate([emb.T, (-0.5 * e2)[None, :]], axis=0)  # (D+1, K)

    kernel = _make_vq_kernel(n)

    q_t_pad, sse = pl.pallas_call(
        kernel,
        grid=(num_blocks,),
        in_specs=[
            pl.BlockSpec((tn_eff, d + 1), lambda i: (i, 0)),   # x row tile
            pl.BlockSpec((d + 1, k), lambda i: (0, 0)),        # codebook resident
        ],
        out_specs=[
            pl.BlockSpec((d + 1, tn_eff), lambda i: (0, i)),   # q^T column tile
            pl.BlockSpec((1, 1), lambda i: (i, 0), memory_space=pltpu.SMEM),
        ],
        out_shape=[
            jax.ShapeDtypeStruct((d + 1, n_pad), jnp.float32),
            jax.ShapeDtypeStruct((num_blocks, 1), jnp.float32),
        ],
        compiler_params=pltpu.CompilerParams(
            dimension_semantics=("parallel",),
            vmem_limit_bytes=32 * 1024 * 1024),
    )(x_aug, et_aug)

    loss = jnp.sum(sse) / (n * d)
    # Drop the bias row, transpose back, drop padded rows.
    q = q_t_pad[:d, :].T[:n]
    # Straight-through estimator x + stop_grad(q - x) has forward value == q.
    return q, loss


def reference_forward(x, emb):
    dist = jnp.sum((x[:, None, :] - emb[None, :, :]) ** 2, axis=2)
    idx = jnp.argmin(dist, axis=1)
    q = emb[idx]
    loss = jnp.mean((x - q) ** 2)
    return q, loss


if __name__ == "__main__":
    key = jax.random.PRNGKey(0)
    k_emb, k_x = jax.random.split(key)

    # Deterministic "checkpoint": embedding.weight ~ N(0, 1), shape (K, D).
    embedding_weight = jax.random.normal(k_emb, (K, D), dtype=jnp.float32)
    # Encoder output: batch of 16 D-dim embeddings.
    encoder_embedding = jax.random.normal(k_x, (16, D), dtype=jnp.float32)

    q, loss = quantizer_forward(encoder_embedding, embedding_weight)
    q = jax.block_until_ready(q)
    loss = jax.block_until_ready(loss)

    q_ref, loss_ref = reference_forward(encoder_embedding, embedding_weight)
    assert q.shape == q_ref.shape, "shape mismatch"
    assert jnp.allclose(q, q_ref, atol=1e-4), "quantized embedding mismatch"
    assert jnp.allclose(loss, loss_ref, atol=1e-5), "loss mismatch"

    print("KERNEL_OK")
</pallas_src>

<mosaic_0001>
module attributes {stable_mosaic.version = 11 : i64} {
  func.func @vq_kernel(%arg0: i32, %arg1: memref<16x11xf32, #tpu.memory_space<vmem>>, %arg2: memref<11x1024xf32, #tpu.memory_space<vmem>>, %arg3: memref<11x16xf32, #tpu.memory_space<vmem>>, %arg4: memref<1x1xf32, #tpu.memory_space<smem>>) attributes {dimension_semantics = [#tpu.dimension_semantics<parallel>], iteration_bounds = array<i64: 1>, scalar_prefetch = 0 : i64, scratch_operands = 0 : i64, tpu.core_type = #tpu.core_type<tc>, window_params = [{transform_indices = @transform_0, window_bounds = array<i64: 16, 11>}, {pipeline_mode = #tpu.pipeline_mode<synchronous>, transform_indices = @transform_1, window_bounds = array<i64: 11, 1024>}, {transform_indices = @transform_2, window_bounds = array<i64: 11, 16>}, {transform_indices = @transform_3, window_bounds = array<i64: 1, 1>}]} {
    %c0 = arith.constant 0 : index
    %c0_0 = arith.constant 0 : index
    %0 = vector.load %arg1[%c0, %c0_0] : memref<16x11xf32, #tpu.memory_space<vmem>>, vector<16x11xf32>
    %c0_1 = arith.constant 0 : index
    %c0_2 = arith.constant 0 : index
    %1 = vector.load %arg2[%c0_1, %c0_2] : memref<11x1024xf32, #tpu.memory_space<vmem>>, vector<11x1024xf32>
    %cst = arith.constant dense<0.000000e+00> : vector<16x1024xf32>
    %2 = tpu.matmul %0, %1, %cst {dimension_numbers = #tpu.dot_dimension_numbers<[1], [0], [0], [1], [0, 0, 1, 1], [], []>} : vector<16x11xf32>, vector<11x1024xf32>, vector<16x1024xf32> -> vector<16x1024xf32>
    %cst_3 = arith.constant dense<0xFF800000> : vector<16xf32>
    %3 = vector.multi_reduction <maximumf>, %2, %cst_3 [1] : vector<16x1024xf32> to vector<16xf32>
    %4 = vector.shape_cast %3 : vector<16xf32> to vector<16x1xf32>
    %5 = tpu.iota {dimensions = array<i32: 1>} : vector<1x1024xi32>
    %6 = vector.broadcast %4 : vector<16x1xf32> to vector<16x1024xf32>
    %7 = arith.cmpf oge, %2, %6 : vector<16x1024xf32>
    %c1024_i32 = arith.constant 1024 : i32
    %8 = vector.shape_cast %5 : vector<1x1024xi32> to vector<1x1024xi32>
    %9 = vector.broadcast %8 : vector<1x1024xi32> to vector<16x1024xi32>
    %10 = vector.broadcast %c1024_i32 : i32 to vector<16x1024xi32>
    %11 = arith.select %7, %9, %10 : vector<16x1024xi1>, vector<16x1024xi32>
    %cst_4 = arith.constant dense<2147483647> : vector<16xi32>
    %12 = vector.multi_reduction <minsi>, %11, %cst_4 [1] : vector<16x1024xi32> to vector<16xi32>
    %13 = vector.shape_cast %12 : vector<16xi32> to vector<16x1xi32>
    %14 = vector.broadcast %5 : vector<1x1024xi32> to vector<16x1024xi32>
    %15 = vector.broadcast %13 : vector<16x1xi32> to vector<16x1024xi32>
    %16 = arith.cmpi eq, %14, %15 : vector<16x1024xi32>
    %17 = arith.extui %16 : vector<16x1024xi1> to vector<16x1024xi32>
    %18 = arith.sitofp %17 : vector<16x1024xi32> to vector<16x1024xf32>
    %cst_5 = arith.constant dense<0.000000e+00> : vector<11x16xf32>
    %19 = tpu.matmul %1, %18, %cst_5 {dimension_numbers = #tpu.dot_dimension_numbers<[1], [1], [0], [0], [0, 0, 1, 0], [], []>} : vector<11x1024xf32>, vector<16x1024xf32>, vector<11x16xf32> -> vector<11x16xf32>
    %c0_6 = arith.constant 0 : index
    %c0_7 = arith.constant 0 : index
    %20 = vector.load %arg3[%c0_6, %c0_7] : memref<11x16xf32, #tpu.memory_space<vmem>>, vector<11x16xf32>
    tpu.vector_store %arg3[%c0_6, %c0_7], %19 {strides = array<i32>} : memref<11x16xf32, #tpu.memory_space<vmem>>, vector<11x16xf32>,
    %21 = arith.mulf %0, %0 : vector<16x11xf32>
    %cst_8 = arith.constant dense<0.000000e+00> : vector<16xf32>
    %22 = vector.multi_reduction <add>, %21, %cst_8 [1] : vector<16x11xf32> to vector<16xf32>
    %23 = vector.shape_cast %22 : vector<16xf32> to vector<16x1xf32>
    %cst_9 = arith.constant 1.000000e+00 : f32
    %24 = vector.broadcast %cst_9 : f32 to vector<16x1xf32>
    %25 = arith.subf %23, %24 : vector<16x1xf32>
    %c16_i32 = arith.constant 16 : i32
    %26 = arith.muli %arg0, %c16_i32 : i32
    %27 = tpu.iota {dimensions = array<i32: 0>} : vector<16x1xi32>
    %28 = vector.broadcast %26 : i32 to vector<16x1xi32>
    %29 = arith.addi %28, %27 : vector<16x1xi32>
    %c16_i32_10 = arith.constant 16 : i32
    %30 = vector.broadcast %c16_i32_10 : i32 to vector<16x1xi32>
    %31 = arith.cmpi slt, %29, %30 : vector<16x1xi32>
    %cst_11 = arith.constant 2.000000e+00 : f32
    %32 = vector.broadcast %cst_11 : f32 to vector<16x1xf32>
    %33 = arith.mulf %32, %4 : vector<16x1xf32>
    %34 = arith.subf %25, %33 : vector<16x1xf32>
    %cst_12 = arith.constant 0.000000e+00 : f32
    %35 = vector.broadcast %cst_12 : f32 to vector<16x1xf32>
    %36 = arith.select %31, %34, %35 : vector<16x1xi1>, vector<16x1xf32>
    %37 = vector.shape_cast %36 : vector<16x1xf32> to vector<1x16x1xf32>
    %cst_13 = arith.constant dense<0.000000e+00> : vector<1xf32>
    %38 = vector.multi_reduction <add>, %37, %cst_13 [1, 2] : vector<1x16x1xf32> to vector<1xf32>
    %39 = vector.shape_cast %38 : vector<1xf32> to vector<1x1x1xf32>
    %40 = vector.extract %39[0, 0, 0] : f32 from vector<1x1x1xf32>
    %c0_14 = arith.constant 0 : index
    %c0_15 = arith.constant 0 : index
    %41 = memref.load %arg4[%c0_14, %c0_15] : memref<1x1xf32, #tpu.memory_space<smem>>
    memref.store %40, %arg4[%c0_14, %c0_15] : memref<1x1xf32, #tpu.memory_space<smem>>
    return
  }
  func.func @transform_0(%arg0: i32) -> (i32, i32) {
    %c0_i32 = arith.constant 0 : i32
    %c0_i32_0 = arith.constant 0 : i32
    return %arg0, %c0_i32 : i32, i32
  }
  func.func @transform_1(%arg0: i32) -> (i32, i32) {
    %c0_i32 = arith.constant 0 : i32
    %c0_i32_0 = arith.constant 0 : i32
    %c0_i32_1 = arith.constant 0 : i32
    return %c0_i32, %c0_i32_0 : i32, i32
  }
  func.func @transform_2(%arg0: i32) -> (i32, i32) {
    %c0_i32 = arith.constant 0 : i32
    %c0_i32_0 = arith.constant 0 : i32
    return %c0_i32, %arg0 : i32, i32
  }
  func.func @transform_3(%arg0: i32) -> (i32, i32) {
    %c0_i32 = arith.constant 0 : i32
    %c0_i32_0 = arith.constant 0 : i32
    return %arg0, %c0_i32 : i32, i32
  }
}

</mosaic_0001>

<bundles_post_ra>
// kernel: quantizer_forward.1
= control target key start
LH: loop header
LB: loop body
LE: loop exit
PB: predicated region body
PF: predicated region fallthrough
CT: control target
= control target key end

     0   :  { %vm39_vm0 = vcmask 1042432   ;;  %vm1014_vm1 = vmmov 1   ;;  %v1015_v7 = vmov 0.0   ;;  %vm32_vm3 = vcmask 89088   ;;  %s1324_s0 = inlined_call_operand.vmem [shape: f32[16,11], index: 0, kind: input, shape index: {}]   ;;  %s1325_s1 = inlined_call_operand.vmem [shape: f32[11,1024], index: 1, kind: input, shape index: {}]   ;;  %s1326_s2 = inlined_call_operand.vmem [shape: f32[11,16], index: 2, kind: output, shape index: {0}]   ;;  %s1327_s3 = inlined_call_operand.hbm [shape: f32[1,1], index: 3, kind: output, shape index: {1}]  }
   0x1   :  { %v17_v0 = vld [vmem:[%s1325_s1 + $0x8] sm:$0xff]  ;;  %v1049_v2 = vld [vmem:[%s1325_s1] sm:$0xff]  ;;  %vm1052_vm2 = vmpackc.low %vm39_vm0, %vm1014_vm1  ;;  %128 = vmatprep.mubr.f32.mxu1 %v1015_v7  ;;  %282 = vmatprep.mubr.f32.mxu0 %v1015_v7 }
   0x2   :  { %v1044_v1 = vld [vmem:[%s1325_s1 + $0x48] sm:$0x7]  ;;  %v1059_v5 = vld [vmem:[%s1325_s1 + $0x40] sm:$0x7]  ;;  %v19_v8 = vld [vmem:[%s1325_s1 + $0x18] sm:$0xff] }
   0x3   :  { %v946_v3 = vpack.c.bf16 %v1044_v1, %v17_v0  ;;  %v949_v6 = vpack.c.bf16 %v1059_v5, %v1049_v2  ;;  %v1069_v9 = vld [vmem:[%s1325_s1 + $0x58] sm:$0x7]  ;;  %v1074_v10 = vld [vmem:[%s1325_s1 + $0x10] sm:$0xff]  ;;  %v1081_v11 = vld [vmem:[%s1324_s0] sm:$0xff] }
   0x4   :  { %v952_v12 = vpack.c.bf16 %v1069_v9, %v19_v8  ;;  %v1087_v13 = vld [vmem:[%s1325_s1 + $0x50] sm:$0x7]  ;;  %v1092_v14 = vld [vmem:[%s1325_s1 + $0x28] sm:$0xff]  ;;  %v1106_v17 = vld [vmem:[%s1325_s1 + $0x20] sm:$0xff] }
   0x5   :  { %948 = vmatprep.subr.msk.bf16.mxu1 %vm1052_vm2, %v946_v3  ;;  %v955_v15 = vpack.c.bf16 %v1087_v13, %v1074_v10  ;;  %v1101_v16 = vld [vmem:[%s1325_s1 + $0x68] sm:$0x7]  ;;  %v1111_v18 = vld [vmem:[%s1325_s1 + $0x60] sm:$0x7]  ;;  %v1122_v21 = vld [vmem:[%s1325_s1 + $0x38] sm:$0xff] }
   0x6   :  { %951 = vmatpush1.bf16.msk.msra.mxu1 %vm1052_vm2, %v949_v6  ;;  %v958_v19 = vpack.c.bf16 %v1101_v16, %v1092_v14  ;;  %v961_v20 = vpack.c.bf16 %v1111_v18, %v1106_v17  ;;  %v1127_v22 = vld [vmem:[%s1325_s1 + $0x78] sm:$0x7] }
   0x7   :  { %954 = vmatprep.subr.msk.bf16.mxu1 %vm1052_vm2, %v952_v12  ;;  %v964_v23 = vpack.c.bf16 %v1127_v22, %v1122_v21 }
   0x8   :  { %9 = vsyncpa [#allocation3], 0  ;;  %960 = vmatprep.subr.msk.bf16.mxu0 %vm1052_vm2, %v958_v19  ;;  %v1140_v24 = vld [vmem:[%s1324_s0 + $0x8] sm:$0xff]  ;;  %v1149_v25 = vld [vmem:[%s1325_s1 + $0x30] sm:$0xff]  ;;  %v390_v58 = vlaneseq  ;;  %s1002_s22 = scalar_lea.hbm %s1327_s3, 16 }
   0x9   :  { %898 = vmatmul.mubr.msk.f32.vlgmr.msra.gmra.mrb[0].mxu1 %vm32_vm3, %v1081_v11  ;;  %963 = vmatpush1.bf16.msk.msra.mxu0 %vm1052_vm2, %v961_v20  ;;  %v1154_v26 = vld [vmem:[%s1325_s1 + $0x70] sm:$0x7]  ;;  %p1003_p0 = scmp.ne.s32.totalorder %s1327_s3, %s1002_s22  ;;  %p1006_p1 = scmp.lt.u32.totalorder %s1002_s22, %s1327_s3 }
   0xa   :  { %957 = vmatpush1.bf16.msk.msra.mxu1 %vm1052_vm2, %v955_v15  ;;  %134 = vmatprep.mubr.f32.mxu1 %v1015_v7  ;;  %v967_v27 = vpack.c.bf16 %v1154_v26, %v1149_v25  ;;  %v1198_v59 = vand.u32 127, %v390_v58  ;;  %v839_v58 = vmul.f32 %v1081_v11, %v1081_v11 }
   0xb   :  { %966 = vmatprep.subr.msk.bf16.mxu1 %vm1052_vm2, %v964_v23  ;;  %p1008_p2 = pnand %p1006_p1, %p1003_p0 }
   0xc   :  { %906 = vmatmul.mubr.msk.f32.vlgmr.msra.gmra.mrb[0].mxu0 %vm32_vm3, %v1081_v11  ;;  %v1201_v60 = vadd.s32 128, %v1198_v59  ;;  %v1204_v61 = vadd.s32 256, %v1198_v59  ;;  %v1207_v62 = vadd.s32 384, %v1198_v59  ;;  %v1215_v3 = vadd.s32 640, %v1198_v59 }
   0xd   :  { %899 = vmatmul.mubr.msk.f32.gmra.mrb[2].mxu1 %vm32_vm3, %v1140_v24  ;;  %288 = vmatprep.mubr.f32.mxu0 %v1015_v7  ;;  %v1218_v4 = vadd.s32 768, %v1198_v59  ;;  %v1221_v6 = vadd.s32 896, %v1198_v59 }
   0xe   :  { %205 = vmatprep.mubr.f32.mxu1 %v1015_v7 }
  0x10   :  { %907 = vmatmul.mubr.msk.f32.gmra.mrb[2].mxu0 %vm32_vm3, %v1140_v24 }
  0x11   :  { %902 = vmatmul.mubr.msk.f32.vlgmr.msra.gmra.mrb[4].mxu1 %vm32_vm3, %v1081_v11  ;;  %674 = vmatprep.mubr.f32.mxu0 %v19_v8 }
  0x12   :  { %969 = vmatpush1.bf16.msk.msra.mxu1 %vm1052_vm2, %v967_v27  ;;  %211 = vmatprep.mubr.f32.mxu1 %v1015_v7 }
  0x15   :  { %903 = vmatmul.mubr.msk.f32.gmra.mrb[6].mxu1 %vm32_vm3, %v1140_v24 }
  0x16   :  { %359 = vmatprep.mubr.f32.mxu1 %v1015_v7 }
  0x19   :  { %910 = vmatmul.mubr.msk.f32.vlgmr.msra.gmra.mrb[8].mxu1 %vm32_vm3, %v1081_v11 }
  0x1a   :  { %365 = vmatprep.mubr.f32.mxu1 %v1015_v7 }
  0x1d   :  { %911 = vmatmul.mubr.msk.f32.gmra.mrb[10].mxu1 %vm32_vm3, %v1140_v24 }
  0x1e   :  { %599 = vmatprep.mubr.f32.mxu1 %v17_v0  ;;  %v1212_v0 = vadd.s32 512, %v1198_v59 }
  0xdc   :  { %v130_v28 = vpop.f32.mrb[0].mxu1 }
  0xdd   :  { %v132_v29 = vpop.f32.mrb[1].mxu1 }
  0xdf   :  { %v284_v32 = vpop.f32.mrb[0].mxu0 }
  0xe0   :  { %v1174_v30 = vpop.f32.mrb[2].mxu1  ;;  %v286_v33 = vpop.f32.mrb[1].mxu0 }
  0xe1   :  { %v1176_v31 = vpop.f32.mrb[3].mxu1 }
  0xe3   :  { %v1178_v38 = vpop.f32.mrb[2].mxu0 }
  0xe4   :  { %v207_v34 = vpop.f32.mrb[4].mxu1  ;;  %v1180_v40 = vpop.f32.mrb[3].mxu0 }
  0xe5   :  { %v372_v35 = vmax.f32 %v130_v28, %v207_v34  ;;  %v209_v36 = vpop.f32.mrb[5].mxu1 }
  0xe6   :  { %v373_v37 = vmax.f32 %v132_v29, %v209_v36 }
  0xe7   :  { %v374_v39 = vmax.f32 %v372_v35, %v284_v32 }
  0xe8   :  { %v375_v41 = vmax.f32 %v373_v37, %v286_v33  ;;  %v1182_v42 = vpop.f32.mrb[6].mxu1 }
  0xe9   :  { %v381_v43 = vmax.f32 %v1174_v30, %v1182_v42  ;;  %v1186_v44 = vpop.f32.mrb[7].mxu1 }
  0xea   :  { %v382_v45 = vmax.f32 %v1176_v31, %v1186_v44 }
  0xeb   :  { %v383_v46 = vmax.f32 %v381_v43, %v1178_v38 }
  0xec   :  { %v384_v47 = vmax.f32 %v382_v45, %v1180_v40  ;;  %v361_v48 = vpop.f32.mrb[8].mxu1 }
  0xed   :  { %v376_v49 = vmax.f32 %v374_v39, %v361_v48  ;;  %v363_v50 = vpop.f32.mrb[9].mxu1 }
  0xee   :  { %v377_v51 = vmax.f32 %v375_v41, %v363_v50 }
  0xf0   :  { %v1192_v52 = vpop.f32.mrb[10].mxu1  ;;  %v378_v53 = vmax.f32 %v376_v49, %v377_v51 }
  0xf1   :  { %v385_v54 = vmax.f32 %v383_v46, %v1192_v52  ;;  %v1195_v55 = vpop.f32.mrb[11].mxu1 }
  0xf2   :  { %v386_v56 = vmax.f32 %v384_v47, %v1195_v55  ;;  %379 = vmax.xlane.f32.xlu0 %v378_v53 }
  0xf4   :  { %v387_v57 = vmax.f32 %v385_v54, %v386_v56 }
  0xf6   :  { %388 = vmax.xlane.f32.xlu0 %v387_v57 }
 0x17f   :  { %v1209_v63 = vpop.xlane.xlu0 %379 }
 0x180   :  { %vm399_vm4 = vcmp.ge.f32.partialorder %v130_v28, %v1209_v63  ;;  %vm400_vm5 = vcmp.ge.f32.partialorder %v132_v29, %v1209_v63  ;;  %vm401_vm6 = vcmp.ge.f32.partialorder %v207_v34, %v1209_v63  ;;  %vm402_vm7 = vcmp.ge.f32.partialorder %v209_v36, %v1209_v63 }
 0x181   :  { %vm403_vm8 = vcmp.ge.f32.partialorder %v284_v32, %v1209_v63  ;;  %vm404_vm9 = vcmp.ge.f32.partialorder %v286_v33, %v1209_v63  ;;  %vm405_vm10 = vcmp.ge.f32.partialorder %v361_v48, %v1209_v63  ;;  %vm406_vm11 = vcmp.ge.f32.partialorder %v363_v50, %v1209_v63 }
 0x182   :  { %v415_v7 = vsel %vm399_vm4, %v1198_v59, 1024  ;;  %v416_v8 = vsel %vm400_vm5, %v1201_v60, 1024  ;;  %v417_v12 = vsel %vm401_vm6, %v1204_v61, 1024  ;;  %v418_v15 = vsel %vm402_vm7, %v1207_v62, 1024 }
 0x183   :  { %v1235_v19 = vpop.xlane.xlu0 %388  ;;  %v419_v20 = vsel %vm403_vm8, %v1212_v0, 1024  ;;  %v420_v23 = vsel %vm404_vm9, %v1215_v3, 1024  ;;  %v421_v27 = vsel %vm405_vm10, %v1218_v4, 1024  ;;  %v422_v28 = vsel %vm406_vm11, %v1221_v6, 1024 }
 0x184   :  { %vm431_vm12 = vcmp.lt.s32.totalorder %v415_v7, %v417_v12  ;;  %vm433_vm13 = vcmp.lt.s32.totalorder %v416_v8, %v418_v15  ;;  %vm407_vm14 = vcmp.ge.f32.partialorder %v1174_v30, %v1235_v19  ;;  %vm408_vm15 = vcmp.ge.f32.partialorder %v1176_v31, %v1235_v19 }
 0x185   :  { %v432_v29 = vsel %vm431_vm12, %v415_v7, %v417_v12  ;;  %v434_v32 = vsel %vm433_vm13, %v416_v8, %v418_v15  ;;  %vm409_vm2 = vcmp.ge.f32.partialorder %v1182_v42, %v1235_v19  ;;  %vm410_vm4 = vcmp.ge.f32.partialorder %v1186_v44, %v1235_v19 }
 0x186   :  { %vm435_vm0 = vcmp.lt.s32.totalorder %v432_v29, %v419_v20  ;;  %vm437_vm1 = vcmp.lt.s32.totalorder %v434_v32, %v420_v23  ;;  %vm411_vm5 = vcmp.ge.f32.partialorder %v1178_v38, %v1235_v19  ;;  %vm412_vm6 = vcmp.ge.f32.partialorder %v1180_v40, %v1235_v19 }
 0x187   :  { %v436_v33 = vsel %vm435_vm0, %v432_v29, %v419_v20  ;;  %v438_v34 = vsel %vm437_vm1, %v434_v32, %v420_v23  ;;  %v423_v30 = vsel %vm407_vm14, %v1198_v59, 1024  ;;  %v424_v31 = vsel %vm408_vm15, %v1201_v60, 1024 }
 0x188   :  { %vm439_vm7 = vcmp.lt.s32.totalorder %v436_v33, %v421_v27  ;;  %vm441_vm8 = vcmp.lt.s32.totalorder %v438_v34, %v422_v28  ;;  %v425_v37 = vsel %vm409_vm2, %v1204_v61, 1024  ;;  %v426_v39 = vsel %vm410_vm4, %v1207_v62, 1024 }
 0x189   :  { %v440_v35 = vsel %vm439_vm7, %v436_v33, %v421_v27  ;;  %v442_v36 = vsel %vm441_vm8, %v438_v34, %v422_v28  ;;  %vm413_vm10 = vcmp.ge.f32.partialorder %v1192_v52, %v1235_v19  ;;  %vm414_vm11 = vcmp.ge.f32.partialorder %v1195_v55, %v1235_v19 }
 0x18a   :  { %vm443_vm9 = vcmp.lt.s32.totalorder %v440_v35, %v442_v36  ;;  %v427_v41 = vsel %vm411_vm5, %v1212_v0, 1024  ;;  %vm459_vm12 = vcmp.lt.s32.totalorder %v423_v30, %v425_v37  ;;  %vm461_vm13 = vcmp.lt.s32.totalorder %v424_v31, %v426_v39 }
 0x18b   :  { %v444_v38 = vsel %vm443_vm9, %v440_v35, %v442_v36  ;;  %v428_v43 = vsel %vm412_vm6, %v1215_v3, 1024  ;;  %v460_v44 = vsel %vm459_vm12, %v423_v30, %v425_v37  ;;  %v462_v45 = vsel %vm461_vm13, %v424_v31, %v426_v39 }
 0x18c   :  { %v446_v42 = vshra.s32 %v444_v38, 16  ;;  %v429_v46 = vsel %vm413_vm10, %v1218_v4, 1024  ;;  %vm463_vm14 = vcmp.lt.s32.totalorder %v460_v44, %v427_v41  ;;  %vm465_vm15 = vcmp.lt.s32.totalorder %v462_v45, %v428_v43 }
 0x18d   :  { %v430_v48 = vsel %vm414_vm11, %v1221_v6, 1024  ;;  %v464_v49 = vsel %vm463_vm14, %v460_v44, %v427_v41  ;;  %v466_v50 = vsel %vm465_vm15, %v462_v45, %v428_v43  ;;  %v445_v55 = vand.u32 65535, %v444_v38 }
 0x18e   :  { %v448_v47 = vcvt.s32.f32 %v446_v42  ;;  %vm467_vm0 = vcmp.lt.s32.totalorder %v464_v49, %v429_v46  ;;  %vm469_vm1 = vcmp.lt.s32.totalorder %v466_v50, %v430_v48  ;;  %v841_v12 = vsel %vm32_vm3, %v839_v58, 0.0 }
 0x18f   :  { %v468_v51 = vsel %vm467_vm0, %v464_v49, %v429_v46  ;;  %v470_v52 = vsel %vm469_vm1, %v466_v50, %v430_v48  ;;  %v447_v57 = vcvt.s32.f32 %v445_v55  ;;  %v840_v23 = vmul.f32 %v1140_v24, %v1140_v24 }
 0x190   :  { %449 = vmin.xlane.f32.xlu1 %v448_v47  ;;  %vm471_vm2 = vcmp.lt.s32.totalorder %v468_v51, %v470_v52  ;;  %v858_v38 = vmul.f32 2.0, %v1209_v63  ;;  %v859_v42 = vmul.f32 2.0, %v1235_v19  ;;  %vm864_vm12 = vcmask 7168  }
 0x191   :  { %v472_v53 = vsel %vm471_vm2, %v468_v51, %v470_v52  ;;  %v844_v28 = vsel %vm32_vm3, %v840_v23, 0.0  ;;  %v1016_v45 = vmov 1.0|1.0  }
 0x192   :  { %v474_v40 = vshra.s32 %v472_v53, 16  ;;  %v473_v8 = vand.u32 65535, %v472_v53 }
 0x194   :  { %v476_v54 = vcvt.s32.f32 %v474_v40  ;;  %v475_v20 = vcvt.s32.f32 %v473_v8 }
 0x196   :  { %477 = vmin.xlane.f32.xlu1 %v476_v54 }
 0x21d   :  { %v450_v56 = vpop.xlane.xlu1 %449 }
 0x21e   :  { %vm451_vm4 = vcmp.eq.f32.partialorder %v448_v47, %v450_v56  ;;  %v456_v11 = vcvt.f32.s32 %v450_v56 }
 0x21f   :  { %v452_v7 = vsel %vm451_vm4, %v447_v57, inf }
 0x220   :  { %453 = vmin.xlane.f32.xlu0 %v452_v7  ;;  %v457_v30 = vshll.u32 %v456_v11, 16 }
 0x223   :  { %v478_v15 = vpop.xlane.xlu1 %477 }
 0x224   :  { %842 = vadd.xlane.f32.xlu0 %v841_v12  ;;  %vm479_vm5 = vcmp.eq.f32.partialorder %v476_v54, %v478_v15  ;;  %v484_v33 = vcvt.f32.s32 %v478_v15 }
 0x225   :  { %v480_v27 = vsel %vm479_vm5, %v475_v20, inf }
 0x226   :  { %481 = vmin.xlane.f32.xlu1 %v480_v27  ;;  %v485_v37 = vshll.u32 %v484_v33, 16 }
 0x22a   :  { %845 = vadd.xlane.f32.xlu1 %v844_v28 }
 0x2ad   :  { %v454_v29 = vpop.xlane.xlu0 %453 }
 0x2ae   :  { %v455_v32 = vcvt.f32.s32 %v454_v29 }
 0x2b0   :  { %v458_v31 = vadd.s32 %v457_v30, %v455_v32 }
 0x2b1   :  { %v843_v34 = vpop.xlane.xlu0 %842 }
 0x2b2   :  { %v944_v36 = vadd.f32 -1.0, %v843_v34  ;;  %vm488_vm3 = vcmp.eq.s32.totalorder %v1201_v60, %v458_v31  ;;  %vm490_vm10 = vcmp.eq.s32.totalorder %v1207_v62, %v458_v31  ;;  %vm487_vm14 = vcmp.eq.s32.totalorder %v1198_v59, %v458_v31 }
 0x2b3   :  { %v482_v35 = vpop.xlane.xlu1 %481  ;;  %vm489_vm1 = vcmp.eq.s32.totalorder %v1204_v61, %v458_v31  ;;  %vm492_vm4 = vcmp.eq.s32.totalorder %v1215_v3, %v458_v31 }
 0x2b4   :  { %v483_v39 = vcvt.f32.s32 %v482_v35  ;;  %v860_v41 = vsub.f32 %v944_v36, %v858_v38 }
 0x2b6   :  { %v486_v24 = vadd.s32 %v485_v37, %v483_v39 }
 0x2b7   :  { %v846_v43 = vpop.xlane.xlu1 %845 }
 0x2b8   :  { %v945_v44 = vadd.f32 -1.0, %v846_v43  ;;  %vm496_vm6 = vcmp.eq.s32.totalorder %v1201_v60, %v486_v24  ;;  %vm498_vm7 = vcmp.eq.s32.totalorder %v1207_v62, %v486_v24  ;;  %vm495_vm8 = vcmp.eq.s32.totalorder %v1198_v59, %v486_v24 }
 0x2b9   :  { %vm970_vm9 = vmpackc.low %vm496_vm6, %vm488_vm3  ;;  %vm497_vm11 = vcmp.eq.s32.totalorder %v1204_v61, %v486_v24  ;;  %vm500_vm15 = vcmp.eq.s32.totalorder %v1215_v3, %v486_v24  ;;  %v865_v60 = vsel %vm864_vm12, %v860_v41, 0.0  ;;  %vm499_vm3 = vcmp.eq.s32.totalorder %v1212_v0, %v486_v24 }
 0x2ba   :  { %v861_v63 = vsub.f32 %v945_v44, %v859_v42  ;;  %971 = vmatprep.subr.msk.bf16.mxu1 %vm970_vm9, %v1016_v45  ;;  %vm974_vm13 = vmpackc.low %vm498_vm7, %vm490_vm10  ;;  %vm502_vm6 = vcmp.eq.s32.totalorder %v1221_v6, %v486_v24  ;;  %vm491_vm7 = vcmp.eq.s32.totalorder %v1212_v0, %v458_v31  ;;  %vm494_vm9 = vcmp.eq.s32.totalorder %v1221_v6, %v458_v31 }
 0x2bb   :  { %975 = vmatprep.subr.msk.bf16.mxu0 %vm974_vm13, %v1016_v45  ;;  %vm972_vm0 = vmpackc.low %vm495_vm8, %vm487_vm14 }
 0x2bc   :  { %973 = vmatpush1.bf16.xpose.msk.msra.mxu1 %vm972_vm0, %v1016_v45  ;;  %vm976_vm2 = vmpackc.low %vm497_vm11, %vm489_vm1  ;;  %v866_v62 = vsel %vm864_vm12, %v861_v63, 0.0  ;;  %vm501_vm11 = vcmp.eq.s32.totalorder %v1218_v4, %v486_v24  ;;  %vm493_vm12 = vcmp.eq.s32.totalorder %v1218_v4, %v458_v31 }
 0x2bd   :  { %977 = vmatpush1.bf16.xpose.msk.msra.mxu0 %vm976_vm2, %v1016_v45  ;;  %vm978_vm5 = vmpackc.low %vm500_vm15, %vm492_vm4  ;;  %v867_v19 = vadd.f32 %v866_v62, %v865_v60 }
 0x2be   :  { %979 = vmatprep.subr.msk.bf16.mxu0 %vm978_vm5, %v1016_v45  ;;  %vm980_vm8 = vmpackc.low %vm499_vm3, %vm491_vm7 }
 0x2bf   :  { %868 = vadd.xlane.f32.xlu0 %v867_v19  ;;  %vm982_vm10 = vmpackc.low %vm502_vm6, %vm494_vm9 }
 0x2c0   :  { %vm984_vm13 = vmpackc.low %vm501_vm11, %vm493_vm12 }
 0x2c3   :  { %600 = vmatmul.mubr.f32.vlgmr.msra.gmra.mrb[12].mxu1 %v1049_v2 }
 0x2c4   :  { %675 = vmatmul.mubr.f32.vlgmr.msra.gmra.mrb[4].mxu0 %v1074_v10  ;;  %604 = vmatprep.mubr.f32.mxu1 %v1044_v1 }
 0x2c5   :  { %981 = vmatpush1.bf16.xpose.msk.msra.mxu0 %vm980_vm8, %v1016_v45  ;;  %679 = vmatprep.mubr.f32.mxu0 %v1069_v9 }
 0x2c6   :  { %983 = vmatprep.subr.msk.bf16.mxu0 %vm982_vm10, %v1016_v45 }
 0x2c7   :  { %605 = vmatmul.mubr.f32.gmra.mrb[14].mxu1 %v1059_v5 }
 0x2c8   :  { %680 = vmatmul.mubr.f32.gmra.mrb[6].mxu0 %v1087_v13 }
 0x2c9   :  { %749 = vmatprep.mubr.f32.mxu0 %v1092_v14 }
 0x2cc   :  { %750 = vmatmul.mubr.f32.vlgmr.msra.gmra.mrb[4].mxu0 %v1106_v17 }
 0x2cd   :  { %985 = vmatpush1.bf16.xpose.msk.msra.mxu0 %vm984_vm13, %v1016_v45  ;;  %754 = vmatprep.mubr.f32.mxu0 %v1101_v16 }
 0x2d0   :  { %755 = vmatmul.mubr.f32.gmra.mrb[6].mxu0 %v1111_v18 }
 0x2d1   :  { %824 = vmatprep.mubr.f32.mxu0 %v1122_v21 }
 0x2d4   :  { %825 = vmatmul.mubr.f32.vlgmr.msra.gmra.mrb[4].mxu0 %v1149_v25 }
 0x2d5   :  { %829 = vmatprep.mubr.f32.mxu0 %v1127_v22 }
 0x2d8   :  { %830 = vmatmul.mubr.f32.gmra.mrb[6].mxu0 %v1154_v26 }
 0x34c   :  { %v869_v1 = vpop.xlane.xlu0 %868 }
 0x34d   :  { %v870_v2 = vrot.slane %v869_v1, 4 }
 0x34f   :  { %v871_v5 = vadd.f32 %v870_v2, %v869_v1 }
 0x351   :  { %v872_v9 = vrot.slane %v871_v5, 2 }
 0x353   :  { %v873_v10 = vadd.f32 %v872_v9, %v871_v5 }
 0x355   :  { %v874_v13 = vrot.slane %v873_v10, 1 }
 0x357   :  { %v875_v14 = vadd.f32 %v874_v13, %v873_v10 }
 0x359   :  { %996 = vpush %v875_v14 }
 0x38a   :  { %s997_s0 = spop %996 }
 0x38b   :  { %878 = sst [smem:[#allocation2]] %s997_s0 }
 0x38c   :  { %1011 = shalt.err (!%p1008_p2)
}
 0x38d   :  { %s1017_s27 = smov [#allocation2]   ;;  %vm835_vm14 = vcmask 130048   ;;  %vm837_vm15 = vcmask 124928  }
 0x38e   :  { %888 = dma.smem_to_hbm %s1017_s27, 16, %s1327_s3, [#allocation3]  }
 0x396   :  { %v601_v16 = vpop.f32.mrb[12].mxu1 }
 0x397   :  { %v603_v17 = vpop.f32.mrb[13].mxu1 }
 0x39a   :  { %v606_v18 = vpop.f32.mrb[14].mxu1 }
 0x39b   :  { %v608_v21 = vpop.f32.mrb[15].mxu1 }
 0x3a7   :  { %v826_v22 = vpop.f32.mrb[4].mxu0 }
 0x3a8   :  { %v986_v25 = vadd.f32 %v826_v22, %v601_v16  ;;  %v828_v26 = vpop.f32.mrb[5].mxu0 }
 0x3aa   :  { %836 = vst.msk [vmem:[%s1326_s2] sm:$0xff] %vm835_vm14, %v986_v25 }
 0x3ab   :  { %v831_v59 = vpop.f32.mrb[6].mxu0 }
 0x3ac   :  { %v987_v61 = vadd.f32 %v831_v59, %v606_v18  ;;  %v833_v0 = vpop.f32.mrb[7].mxu0 }
 0x3ae   :  { %838 = vst.msk [vmem:[%s1326_s2 + $0x8] sm:$0x7] %vm837_vm15, %v987_v61 }
 0x3af   :  { %1012 = dma.done.wait [#allocation3], 16  }
 0x3b0   :  { %1013 = vsyncadd [#allocation3], 4294967280 }
 0x3b1   :  { %894 = sfence }
 0x3b2   :  { %895 = vsyncpa [#allocation3], 1 }

</bundles_post_ra>
